<compile_context>
chip_gen: v7x
topology: tpu7x:2x2x1
jax: 0.10.0
libtpu: 0.0.40
codegen_flags: <defaults>
</compile_context>

<pallas_src>
import jax
import jax.numpy as jnp
from jax.experimental import pallas as pl
from jax.experimental.pallas import tpu as pltpu


# ----------------------------- Pallas kernel ------------------------------

def _matmul_kernel(a_ref, b_ref, o_ref, acc_ref):
    """Grid = (B, M/tm, N/tn, K/tk); K (axis 3) is the reduction axis."""
    @pl.when(pl.program_id(3) == 0)
    def _():
        acc_ref[...] = jnp.zeros_like(acc_ref)

    acc_ref[...] += jnp.dot(a_ref[0], b_ref[0],
                            preferred_element_type=jnp.float32)

    @pl.when(pl.program_id(3) == pl.num_programs(3) - 1)
    def _():
        o_ref[0] = acc_ref[...].astype(o_ref.dtype)


# ------------------------------- wrappers ----------------------------------

def _round_up(x, m):
    return (x + m - 1) // m * m


def _batched_matmul_pallas(a, b, *, tm=256, tn=256, tk=512):
    """a: (B, M, K), b: (B, K, N) -> (B, M, N) with f32 accumulation."""
    B, M, K = a.shape
    _, _, N = b.shape
    out_dtype = jnp.result_type(a.dtype, b.dtype)

    # Pad to TPU-friendly tiles: sublane (8) on M, lane (128) on K and N.
    # Zero padding on K contributes nothing to the dot products.
    Mp = _round_up(M, 8)
    Kp = _round_up(K, 128)
    Np = _round_up(N, 128)
    tm = min(tm, Mp)
    tk = min(tk, Kp)
    tn = min(tn, Np)
    Mp = _round_up(Mp, tm)
    Kp = _round_up(Kp, tk)
    Np = _round_up(Np, tn)

    a_p = jnp.pad(a, ((0, 0), (0, Mp - M), (0, Kp - K)))
    b_p = jnp.pad(b, ((0, 0), (0, Kp - K), (0, Np - N)))

    grid = (B, Mp // tm, Np // tn, Kp // tk)

    out = pl.pallas_call(
        _matmul_kernel,
        out_shape=jax.ShapeDtypeStruct((B, Mp, Np), out_dtype),
        grid_spec=pltpu.PrefetchScalarGridSpec(
            num_scalar_prefetch=0,
            grid=grid,
            in_specs=[
                pl.BlockSpec((1, tm, tk), lambda bb, i, j, k: (bb, i, k)),
                pl.BlockSpec((1, tk, tn), lambda bb, i, j, k: (bb, k, j)),
            ],
            out_specs=pl.BlockSpec((1, tm, tn), lambda bb, i, j, k: (bb, i, j)),
            scratch_shapes=[pltpu.VMEM((tm, tn), jnp.float32)],
        ),
        compiler_params=pltpu.CompilerParams(
            dimension_semantics=("parallel", "parallel", "parallel",
                                 "arbitrary")),
    )(a_p, b_p)

    return out[:, :M, :N]


def matmul_pallas(x1, x2, **tile_kw):
    """PyTorch-style `x1 @ x2` for operands with ndim >= 2 (batch broadcast)."""
    if x1.ndim < 2 or x2.ndim < 2:
        # TODO(synk): 1-D operand (vector) matmul broadcasting not implemented.
        raise NotImplementedError("matmul_pallas requires ndim >= 2 operands")
    M, K = x1.shape[-2:]
    K2, N = x2.shape[-2:]
    if K != K2:
        raise ValueError(f"inner dims mismatch: {K} vs {K2}")

    batch_shape = jnp.broadcast_shapes(x1.shape[:-2], x2.shape[:-2])
    a = jnp.broadcast_to(x1, batch_shape + (M, K)).reshape((-1, M, K))
    b = jnp.broadcast_to(x2, batch_shape + (K, N)).reshape((-1, K, N))

    out = _batched_matmul_pallas(a, b, **tile_kw)
    return out.reshape(batch_shape + (M, N))


# ----------------------------------- main -----------------------------------

if __name__ == "__main__":
    key = jax.random.PRNGKey(0)
    k1, k2, k3, k4 = jax.random.split(key, 4)

    # Small batched shapes consistent with forward(x1, x2) -> x1 @ x2.
    x1 = jax.random.normal(k1, (2, 96, 160), jnp.float32)
    x2 = jax.random.normal(k2, (2, 160, 112), jnp.float32)

    fn = jax.jit(matmul_pallas)
    out = jax.block_until_ready(fn(x1, x2))
    ref = jnp.matmul(x1, x2)

    assert out.shape == ref.shape == (2, 96, 112)
    assert bool(jnp.all(jnp.isfinite(out)))
    assert bool(jnp.allclose(out, ref, rtol=1e-4, atol=1e-4))

    # Plain 2-D matmul path (ragged, exercises padding + lane-dense output).
    y1 = jax.random.normal(k3, (64, 200), jnp.float32)
    y2 = jax.random.normal(k4, (200, 48), jnp.float32)
    out2 = jax.block_until_ready(jax.jit(matmul_pallas)(y1, y2))
    ref2 = jnp.matmul(y1, y2)
    assert out2.shape == (64, 48)
    assert bool(jnp.allclose(out2, ref2, rtol=1e-4, atol=1e-4))

    print("KERNEL_OK")
</pallas_src>

<mosaic_0001>
module attributes {stable_mosaic.version = 11 : i64} {
  func.func @_matmul_kernel(%arg0: i32, %arg1: i32, %arg2: i32, %arg3: i32, %arg4: memref<1x96x256xf32, #tpu.memory_space<vmem>>, %arg5: memref<1x256x128xf32, #tpu.memory_space<vmem>>, %arg6: memref<1x96x128xf32, #tpu.memory_space<vmem>>, %arg7: memref<96x128xf32, #tpu.memory_space<vmem>>) attributes {dimension_semantics = [#tpu.dimension_semantics<parallel>, #tpu.dimension_semantics<parallel>, #tpu.dimension_semantics<parallel>, #tpu.dimension_semantics<arbitrary>], iteration_bounds = array<i64: 2, 1, 1, 1>, scalar_prefetch = 0 : i64, scratch_operands = 1 : i64, tpu.core_type = #tpu.core_type<tc>, window_params = [{transform_indices = @transform_0, window_bounds = array<i64: 1, 96, 256>}, {transform_indices = @transform_1, window_bounds = array<i64: 1, 256, 128>}, {transform_indices = @transform_2, window_bounds = array<i64: 1, 96, 128>}]} {
    %c0_i32 = arith.constant 0 : i32
    %0 = arith.cmpi eq, %arg3, %c0_i32 : i32
    %1 = arith.extui %0 : i1 to i32
    %c0_i32_0 = arith.constant 0 : i32
    %2 = arith.cmpi ne, %1, %c0_i32_0 : i32
    scf.if %2 {
      %cst_12 = arith.constant 0.000000e+00 : f32
      %14 = vector.broadcast %cst_12 : f32 to vector<96x128xf32>
      %c0_13 = arith.constant 0 : index
      %c0_14 = arith.constant 0 : index
      %15 = vector.load %arg7[%c0_13, %c0_14] : memref<96x128xf32, #tpu.memory_space<vmem>>, vector<96x128xf32>
      tpu.vector_store %arg7[%c0_13, %c0_14], %14 {strides = array<i32>} : memref<96x128xf32, #tpu.memory_space<vmem>>, vector<96x128xf32>,
    } else {
    }
    %c0 = arith.constant 0 : index
    %c0_1 = arith.constant 0 : index
    %3 = vector.load %arg7[%c0, %c0_1] : memref<96x128xf32, #tpu.memory_space<vmem>>, vector<96x128xf32>
    %c0_2 = arith.constant 0 : index
    %c0_3 = arith.constant 0 : index
    %c0_4 = arith.constant 0 : index
    %4 = vector.load %arg4[%c0_2, %c0_3, %c0_4] : memref<1x96x256xf32, #tpu.memory_space<vmem>>, vector<1x96x256xf32>
    %5 = vector.shape_cast %4 : vector<1x96x256xf32> to vector<96x256xf32>
    %c0_5 = arith.constant 0 : index
    %c0_6 = arith.constant 0 : index
    %c0_7 = arith.constant 0 : index
    %6 = vector.load %arg5[%c0_5, %c0_6, %c0_7] : memref<1x256x128xf32, #tpu.memory_space<vmem>>, vector<1x256x128xf32>
    %7 = vector.shape_cast %6 : vector<1x256x128xf32> to vector<256x128xf32>
    %cst = arith.constant dense<0.000000e+00> : vector<96x128xf32>
    %8 = tpu.matmul %5, %7, %cst {dimension_numbers = #tpu.dot_dimension_numbers<[1], [0], [0], [1], [0, 0, 1, 1], [], []>} : vector<96x256xf32>, vector<256x128xf32>, vector<96x128xf32> -> vector<96x128xf32>
    %9 = arith.addf %3, %8 : vector<96x128xf32>
    %c0_8 = arith.constant 0 : index
    %c0_9 = arith.constant 0 : index
    %10 = vector.load %arg7[%c0_8, %c0_9] : memref<96x128xf32, #tpu.memory_space<vmem>>, vector<96x128xf32>
    tpu.vector_store %arg7[%c0_8, %c0_9], %9 {strides = array<i32>} : memref<96x128xf32, #tpu.memory_space<vmem>>, vector<96x128xf32>,
    %c0_i32_10 = arith.constant 0 : i32
    %11 = arith.cmpi eq, %arg3, %c0_i32_10 : i32
    %12 = arith.extui %11 : i1 to i32
    %c0_i32_11 = arith.constant 0 : i32
    %13 = arith.cmpi ne, %12, %c0_i32_11 : i32
    scf.if %13 {
      %c0_12 = arith.constant 0 : index
      %c0_13 = arith.constant 0 : index
      %14 = vector.load %arg7[%c0_12, %c0_13] : memref<96x128xf32, #tpu.memory_space<vmem>>, vector<96x128xf32>
      %c0_14 = arith.constant 0 : index
      %c0_15 = arith.constant 0 : index
      %c0_16 = arith.constant 0 : index
      %15 = vector.load %arg6[%c0_14, %c0_15, %c0_16] : memref<1x96x128xf32, #tpu.memory_space<vmem>>, vector<1x96x128xf32>
      %16 = vector.shape_cast %15 : vector<1x96x128xf32> to vector<96x128xf32>
      %17 = vector.shape_cast %14 : vector<96x128xf32> to vector<1x96x128xf32>
      tpu.vector_store %arg6[%c0_14, %c0_15, %c0_16], %17 {strides = array<i32>} : memref<1x96x128xf32, #tpu.memory_space<vmem>>, vector<1x96x128xf32>,
    } else {
    }
    return
  }
  func.func @transform_0(%arg0: i32, %arg1: i32, %arg2: i32, %arg3: i32) -> (i32, i32, i32) {
    %c0_i32 = arith.constant 0 : i32
    return %arg0, %arg1, %arg3 : i32, i32, i32
  }
  func.func @transform_1(%arg0: i32, %arg1: i32, %arg2: i32, %arg3: i32) -> (i32, i32, i32) {
    %c0_i32 = arith.constant 0 : i32
    return %arg0, %arg3, %arg2 : i32, i32, i32
  }
  func.func @transform_2(%arg0: i32, %arg1: i32, %arg2: i32, %arg3: i32) -> (i32, i32, i32) {
    %c0_i32 = arith.constant 0 : i32
    return %arg0, %arg1, %arg2 : i32, i32, i32
  }
}

</mosaic_0001>

<bundles_post_ra>
// kernel: matmul_pallas.1
= control target key start
LH: loop header
LB: loop body
LE: loop exit
PB: predicated region body
PF: predicated region fallthrough
CT: control target
= control target key end

     0   :  { %7 = vsyncpa [#allocation4], 0  ;;  %s1132_s0 = inlined_call_operand.vmem [shape: f32[2,96,256], index: 0, kind: input, shape index: {}]   ;;  %s1133_s1 = inlined_call_operand.vmem [shape: f32[2,256,128], index: 1, kind: input, shape index: {}]   ;;  %s1134_s2 = inlined_call_operand.hbm [shape: f32[2,96,128], index: 2, kind: output, shape index: {}]  }
   0x1   :  { %9 = vsyncpa [#allocation4 + $0x1], 0  ;;  %s931_s9 = smov 0   ;;  %s933_s10 = smov 0  }
   0x2   :  { %s935_s11 = smov 0   ;;  %s937_s12 = smov 0  }
   0x3   :  { %s939_s13 = smov 0   ;;  %s941_s14 = smov 0  }
   0x4 LB: > { %s645_s15 = sadd.s32 4294967295, %s911_s14   ;;  %s646_s16 = sadd.s32 4294967294, %s911_s14   ;;  %s911_s14 = sphi %s941_s14, %s15_s14   ;;  %s907_s13 = sphi %s939_s13, %s1141_s13   ;;  %s903_s12 = sphi %s937_s12, %s1140_s12   ;;  %s899_s11 = sphi %s935_s11, %s1139_s11   ;;  %s895_s10 = sphi %s933_s10, %s1138_s10   ;;  %s891_s9 = sphi %s931_s9, %s1137_s9  }
   0x5   : > { %s41_s17 = sadd.s32 1, %s907_s13  ;;  %s112_s18 = sadd.s32 1, %s899_s11 }
   0x6   : > { %p43_p0 = scmp.ge.s32.totalorder %s41_s17, 2  ;;  %p122_p1 = scmp.ne.s32.totalorder %s899_s11, %s895_s10 }
   0x7   : > { %p123_p2 = scmp.eq.s32.totalorder %s645_s15, 1  ;;  %p128_p3 = scmp.ne.s32.totalorder %s895_s10, %s891_s9 }
   0x8   : > { %s1143_s17 = smov (%p43_p0, %s41_s17), 0  ;;  %p129_p5 = scmp.eq.s32.totalorder %s646_s16, 1 }
   0x9   : > { %p971_p4 = por %p123_p2, %p122_p1  ;;  %s105_s20 = ssub.s32 %s907_s13, %s1143_s17 }
   0xa   : > { %p649_p6 = scmp.ge.s32.totalorder %s911_s14, 1  ;;  %p110_p7 = scmp.eq.s32.totalorder %s105_s20, 0 }
   0xb   : > { %p978_p8 = por %p129_p5, %p128_p3  ;;  %p182_p9 = scmp.lt.s32.totalorder %s911_s14, 3 }
   0xc   : > { %s984_s22 = scalar_select %p110_p7, %s899_s11, %s112_s18  }
   0xd   : > { %p183_p10 = pnand %p649_p6, %p182_p9 }
   0xe   : > { %p227_p11 = scmp.lt.s32.totalorder (!%p183_p10), %s903_s12, 1  ;;  %s222_s4 = sand.u32 (!%p183_p10), 1, %s895_s10  }
   0xf   : > { %186 = sbr.rel (%p183_p10) target bundleno = 311 (0x137), region = 28 }
  0x10   : > { %s773_s5 = smul.u32 (!%p183_p10), 96, %s222_s4 }
  0x11   : > { %s775_s7 = smul.u32 (!%p183_p10), 1536, %s903_s12 }
  0x12   : > { %s1061_s6 = scalar_lea.vmem (!%p183_p10), [#allocation3], %s773_s5 }
  0x13   : > { %s532_s8 = sshll.u32 (!%p183_p10), %s1061_s6, 4  ;;  %s1078_s18 = scalar_lea.hbm (!%p183_p10), %s1134_s2, %s775_s7  ;;  %s1080_s8 = int_to_ptr.vmem [resolvable:$true] %s532_s8 }
  0x14   : > { %s833_s20 = scalar_lea.vmem (!%p183_p10), %s1080_s8, 1536 }
  0x15   : > { %p834_p12 = scmp.ne.s32.totalorder (!%p183_p10), %s1080_s8, %s833_s20 }
  0x16   : > { %s988_s23 = scalar_select %p227_p11, %s903_s12, 1 }
  0x17   : > { %s1086_s12 = scalar_lea.sflag [#allocation4], %s222_s4  ;;  %p835_p13 = pnand %p834_p12, %p971_p4 }
  0x18   : > { %s656_s24 = sshll.u32 %s988_s23, 8  ;;  %s774_s28 = smul.u32 192, %s988_s23 }
  0x19   : > { %s994_s27 = scalar_lea.vmem %s1133_s1, %s656_s24  ;;  %p836_p0 = pneg %p835_p13 }
  0x1a   : > { %v323_v0 = vld [vmem:[%s994_s27 + $0x80] sm:$0xff]  ;;  %v324_v1 = vld [vmem:[%s994_s27 + $0x88] sm:$0xff]  ;;  %v325_v5 = vld [vmem:[%s994_s27 + $0x90] sm:$0xff]  ;;  %s1014_s3 = scalar_lea.vmem %s1132_s0, %s774_s28  ;;  %s913_s23 = smov [#allocation3]  }
  0x1b   : > { %v307_v2 = vld [vmem:[%s994_s27] sm:$0xff]  ;;  %v725_v3 = vpack.c.bf16 %v324_v1, %v323_v0  ;;  %v308_v4 = vld [vmem:[%s994_s27 + $0x8] sm:$0xff]  ;;  %v326_v6 = vld [vmem:[%s994_s27 + $0x98] sm:$0xff]  ;;  %s837_s24 = sshll.u32 %s913_s23, 4  ;;  %s838_s24 = int_to_ptr.vmem [resolvable:$false] %s837_s24 }
  0x1c   : > { %v727_v7 = vpack.c.bf16 %v308_v4, %v307_v2  ;;  %v729_v8 = vpack.c.bf16 %v326_v6, %v325_v5  ;;  %v309_v9 = vld [vmem:[%s994_s27 + $0x10] sm:$0xff]  ;;  %v310_v10 = vld [vmem:[%s994_s27 + $0x18] sm:$0xff]  ;;  %v327_v11 = vld [vmem:[%s994_s27 + $0xa0] sm:$0xff]  ;;  %s839_s25 = scalar_lea.vmem %s838_s24, 3072  ;;  %p840_p1 = scmp.lt.s32.totalorder %s1080_s8, %s838_s24 }
  0x1d   : > { %726 = vmatprep.subr.bf16.mxu0 %v725_v3  ;;  %757 = vmatprep.subr.bf16.mxu1 %v725_v3  ;;  %v328_v12 = vld [vmem:[%s994_s27 + $0xa8] sm:$0xff]  ;;  %v731_v13 = vpack.c.bf16 %v310_v10, %v309_v9  ;;  %v311_v15 = vld [vmem:[%s994_s27 + $0x20] sm:$0xff]  ;;  %v329_v17 = vld [vmem:[%s994_s27 + $0xb0] sm:$0xff]  ;;  %p841_p2 = scmp.lt.s32.totalorder %s839_s25, %s833_s20 }
  0x1e   : > { %728 = vmatpush3.bf16.msra.mxu0 %v727_v7  ;;  %765 = vmatpush3.bf16.msra.mxu1 %v727_v7  ;;  %v733_v14 = vpack.c.bf16 %v328_v12, %v327_v11  ;;  %v312_v16 = vld [vmem:[%s994_s27 + $0x28] sm:$0xff]  ;;  %v330_v18 = vld [vmem:[%s994_s27 + $0xb8] sm:$0xff]  ;;  %v313_v21 = vld [vmem:[%s994_s27 + $0x30] sm:$0xff] }
  0x1f   : > { %730 = vmatprep.subr.bf16.mxu0 %v729_v8  ;;  %758 = vmatprep.subr.bf16.mxu1 %v729_v8  ;;  %v735_v19 = vpack.c.bf16 %v312_v16, %v311_v15  ;;  %v737_v20 = vpack.c.bf16 %v330_v18, %v329_v17  ;;  %v314_v22 = vld [vmem:[%s994_s27 + $0x38] sm:$0xff]  ;;  %v331_v23 = vld [vmem:[%s994_s27 + $0xc0] sm:$0xff]  ;;  %v332_v24 = vld [vmem:[%s994_s27 + $0xc8] sm:$0xff]  ;;  %p842_p3 = por %p841_p2, %p840_p1 }
  0x20   : > { %v284_v25 = vld [vmem:[%s1014_s3 + $0x8] sm:$0xff]  ;;  %v739_v27 = vpack.c.bf16 %v314_v22, %v313_v21  ;;  %v741_v28 = vpack.c.bf16 %v332_v24, %v331_v23  ;;  %v315_v29 = vld [vmem:[%s994_s27 + $0x40] sm:$0xff]  ;;  %v333_v31 = vld [vmem:[%s994_s27 + $0xd0] sm:$0xff] }
  0x21   : > { %403 = vmatprep.mubr.f32.mxu0 %v284_v25  ;;  %v296_v26 = vld [vmem:[%s1014_s3 + $0x68] sm:$0xff]  ;;  %v334_v32 = vld [vmem:[%s994_s27 + $0xd8] sm:$0xff]  ;;  %v317_v35 = vld [vmem:[%s994_s27 + $0x50] sm:$0xff]  ;;  %p843_p5 = pnand %p842_p3, %p836_p0 }
  0x22   : > { %732 = vmatpush3.bf16.msra.mxu0 %v731_v13  ;;  %766 = vmatpush3.bf16.msra.mxu1 %v731_v13  ;;  %v316_v30 = vld [vmem:[%s994_s27 + $0x48] sm:$0xff]  ;;  %v745_v34 = vpack.c.bf16 %v334_v32, %v333_v31  ;;  %v318_v36 = vld [vmem:[%s994_s27 + $0x58] sm:$0xff]  ;;  %v335_v37 = vld [vmem:[%s994_s27 + $0xe0] sm:$0xff] }
  0x23   : > { %734 = vmatprep.subr.bf16.mxu0 %v733_v14  ;;  %759 = vmatprep.subr.bf16.mxu1 %v733_v14  ;;  %v743_v33 = vpack.c.bf16 %v316_v30, %v315_v29  ;;  %v336_v38 = vld [vmem:[%s994_s27 + $0xe8] sm:$0xff]  ;;  %v747_v39 = vpack.c.bf16 %v318_v36, %v317_v35  ;;  %v319_v41 = vld [vmem:[%s994_s27 + $0x60] sm:$0xff]  ;;  %v337_v43 = vld [vmem:[%s994_s27 + $0xf0] sm:$0xff] }
  0x24   : > { %433 = vmatprep.mubr.f32.mxu1 %v296_v26  ;;  %v749_v40 = vpack.c.bf16 %v336_v38, %v335_v37  ;;  %v320_v42 = vld [vmem:[%s994_s27 + $0x68] sm:$0xff]  ;;  %v338_v44 = vld [vmem:[%s994_s27 + $0xf8] sm:$0xff]  ;;  %v321_v47 = vld [vmem:[%s994_s27 + $0x70] sm:$0xff] }
  0x25   : > { %v751_v45 = vpack.c.bf16 %v320_v42, %v319_v41  ;;  %v753_v46 = vpack.c.bf16 %v338_v44, %v337_v43  ;;  %v322_v48 = vld [vmem:[%s994_s27 + $0x78] sm:$0xff]  ;;  %v283_v50 = vld [vmem:[%s1014_s3] sm:$0xff]  ;;  %v285_v54 = vld [vmem:[%s1014_s3 + $0x10] sm:$0xff] }
  0x26   : > { %736 = vmatpush3.bf16.msra.mxu0 %v735_v19  ;;  %767 = vmatpush3.bf16.msra.mxu1 %v735_v19  ;;  %v755_v49 = vpack.c.bf16 %v322_v48, %v321_v47  ;;  %v295_v51 = vld [vmem:[%s1014_s3 + $0x60] sm:$0xff]  ;;  %v286_v52 = vld [vmem:[%s1014_s3 + $0x18] sm:$0xff]  ;;  %v297_v55 = vld [vmem:[%s1014_s3 + $0x70] sm:$0xff] }
  0x27   : > { %738 = vmatprep.subr.bf16.mxu0 %v737_v20  ;;  %760 = vmatprep.subr.bf16.mxu1 %v737_v20  ;;  %v298_v53 = vld [vmem:[%s1014_s3 + $0x78] sm:$0xff]  ;;  %v288_v56 = vld [vmem:[%s1014_s3 + $0x28] sm:$0xff]  ;;  %v287_v58 = vld [vmem:[%s1014_s3 + $0x20] sm:$0xff] }
  0x28   : > { %v300_v57 = vld [vmem:[%s1014_s3 + $0x88] sm:$0xff]  ;;  %v299_v59 = vld [vmem:[%s1014_s3 + $0x80] sm:$0xff]  ;;  %v290_v60 = vld [vmem:[%s1014_s3 + $0x38] sm:$0xff] }
  0x29   : > { %v302_v61 = vld [vmem:[%s1014_s3 + $0x98] sm:$0xff]  ;;  %v289_v62 = vld [vmem:[%s1014_s3 + $0x30] sm:$0xff]  ;;  %v292_v0 = vld [vmem:[%s1014_s3 + $0x48] sm:$0xff] }
  0x2a   : > { %740 = vmatpush3.bf16.msra.mxu0 %v739_v27  ;;  %768 = vmatpush3.bf16.msra.mxu1 %v739_v27  ;;  %v301_v63 = vld [vmem:[%s1014_s3 + $0x90] sm:$0xff]  ;;  %v304_v1 = vld [vmem:[%s1014_s3 + $0xa8] sm:$0xff]  ;;  %v291_v2 = vld [vmem:[%s1014_s3 + $0x40] sm:$0xff] }
  0x2b   : > { %742 = vmatprep.subr.bf16.mxu0 %v741_v28  ;;  %761 = vmatprep.subr.bf16.mxu1 %v741_v28  ;;  %v303_v3 = vld [vmem:[%s1014_s3 + $0xa0] sm:$0xff]  ;;  %v294_v4 = vld [vmem:[%s1014_s3 + $0x58] sm:$0xff]  ;;  %v293_v6 = vld [vmem:[%s1014_s3 + $0x50] sm:$0xff] }
  0x2c   : > { %v306_v5 = vld [vmem:[%s1014_s3 + $0xb8] sm:$0xff]  ;;  %v305_v7 = vld [vmem:[%s1014_s3 + $0xb0] sm:$0xff] }
  0x2e   : > { %744 = vmatpush3.bf16.msra.mxu0 %v743_v33  ;;  %769 = vmatpush3.bf16.msra.mxu1 %v743_v33 }
  0x2f   : > { %746 = vmatprep.subr.bf16.mxu0 %v745_v34  ;;  %762 = vmatprep.subr.bf16.mxu1 %v745_v34 }
  0x32   : > { %748 = vmatpush3.bf16.msra.mxu0 %v747_v39  ;;  %770 = vmatpush3.bf16.msra.mxu1 %v747_v39 }
  0x33   : > { %750 = vmatprep.subr.bf16.mxu0 %v749_v40  ;;  %763 = vmatprep.subr.bf16.mxu1 %v749_v40 }
  0x36   : > { %752 = vmatpush3.bf16.msra.mxu0 %v751_v45  ;;  %771 = vmatpush3.bf16.msra.mxu1 %v751_v45 }
  0x37   : > { %754 = vmatprep.subr.bf16.mxu0 %v753_v46  ;;  %764 = vmatprep.subr.bf16.mxu1 %v753_v46 }
  0x3a   : > { %756 = vmatpush3.bf16.msra.mxu0 %v755_v49  ;;  %772 = vmatpush3.bf16.msra.mxu1 %v755_v49 }
  0x3d   : > { %404 = vmatmul.mubr.f32.vlgmr.msra.gmra.mrb[0].mxu0 %v283_v50  ;;  %434 = vmatmul.mubr.f32.vlgmr.msra.gmra.mrb[0].mxu1 %v295_v51 }
  0x3e   : > { %408 = vmatprep.mubr.f32.mxu0 %v286_v52  ;;  %438 = vmatprep.mubr.f32.mxu1 %v298_v53 }
  0x41   : > { %409 = vmatmul.mubr.f32.gmra.mrb[2].mxu0 %v285_v54  ;;  %439 = vmatmul.mubr.f32.gmra.mrb[2].mxu1 %v297_v55 }
  0x42   : > { %413 = vmatprep.mubr.f32.mxu0 %v288_v56  ;;  %443 = vmatprep.mubr.f32.mxu1 %v300_v57 }
  0x45   : > { %414 = vmatmul.mubr.f32.gmra.mrb[4].mxu0 %v287_v58  ;;  %444 = vmatmul.mubr.f32.gmra.mrb[4].mxu1 %v299_v59 }
  0x46   : > { %418 = vmatprep.mubr.f32.mxu0 %v290_v60  ;;  %448 = vmatprep.mubr.f32.mxu1 %v302_v61 }
  0x49   : > { %419 = vmatmul.mubr.f32.gmra.mrb[6].mxu0 %v289_v62  ;;  %449 = vmatmul.mubr.f32.gmra.mrb[6].mxu1 %v301_v63 }
  0x4a   : > { %423 = vmatprep.mubr.f32.mxu0 %v292_v0  ;;  %453 = vmatprep.mubr.f32.mxu1 %v304_v1 }
  0x4d   : > { %424 = vmatmul.mubr.f32.gmra.mrb[8].mxu0 %v291_v2  ;;  %454 = vmatmul.mubr.f32.gmra.mrb[8].mxu1 %v303_v3 }
  0x4e   : > { %428 = vmatprep.mubr.f32.mxu0 %v294_v4  ;;  %458 = vmatprep.mubr.f32.mxu1 %v306_v5 }
  0x51   : > { %429 = vmatmul.mubr.f32.gmra.mrb[10].mxu0 %v293_v6  ;;  %459 = vmatmul.mubr.f32.gmra.mrb[10].mxu1 %v305_v7 }
 0x110   : > { %v689_v8 = vpop.f32.mrb[0].mxu0  ;;  %v707_v9 = vpop.f32.mrb[0].mxu1 }
 0x111   : > { %v690_v10 = vpop.f32.mrb[1].mxu0  ;;  %v708_v11 = vpop.f32.mrb[1].mxu1 }
 0x112   : > { %v691_v12 = vadd.f32 %v690_v10, %v689_v8  ;;  %v709_v13 = vadd.f32 %v708_v11, %v707_v9 }
 0x114   : > { %503 = vst [vmem:[%s1061_s6] sm:$0xff] %v691_v12  ;;  %509 = vst [vmem:[%s1061_s6 + $0x30] sm:$0xff] %v709_v13  ;;  %v692_v14 = vpop.f32.mrb[2].mxu0  ;;  %v710_v15 = vpop.f32.mrb[2].mxu1 }
 0x115   : > { %v693_v16 = vpop.f32.mrb[3].mxu0  ;;  %v711_v17 = vpop.f32.mrb[3].mxu1 }
 0x116   : > { %v694_v18 = vadd.f32 %v693_v16, %v692_v14  ;;  %v712_v19 = vadd.f32 %v711_v17, %v710_v15 }
 0x118   : > { %504 = vst [vmem:[%s1061_s6 + $0x8] sm:$0xff] %v694_v18  ;;  %510 = vst [vmem:[%s1061_s6 + $0x38] sm:$0xff] %v712_v19  ;;  %v695_v20 = vpop.f32.mrb[4].mxu0  ;;  %v713_v21 = vpop.f32.mrb[4].mxu1 }
 0x119   : > { %v696_v22 = vpop.f32.mrb[5].mxu0  ;;  %v714_v23 = vpop.f32.mrb[5].mxu1 }
 0x11a   : > { %v697_v24 = vadd.f32 %v696_v22, %v695_v20  ;;  %v715_v25 = vadd.f32 %v714_v23, %v713_v21 }
 0x11c   : > { %505 = vst [vmem:[%s1061_s6 + $0x10] sm:$0xff] %v697_v24  ;;  %511 = vst [vmem:[%s1061_s6 + $0x40] sm:$0xff] %v715_v25  ;;  %v698_v26 = vpop.f32.mrb[6].mxu0  ;;  %v716_v27 = vpop.f32.mrb[6].mxu1 }
 0x11d   : > { %v699_v28 = vpop.f32.mrb[7].mxu0  ;;  %v717_v29 = vpop.f32.mrb[7].mxu1 }
 0x11e   : > { %v700_v30 = vadd.f32 %v699_v28, %v698_v26  ;;  %v718_v31 = vadd.f32 %v717_v29, %v716_v27 }
 0x120   : > { %506 = vst [vmem:[%s1061_s6 + $0x18] sm:$0xff] %v700_v30  ;;  %512 = vst [vmem:[%s1061_s6 + $0x48] sm:$0xff] %v718_v31  ;;  %v701_v32 = vpop.f32.mrb[8].mxu0  ;;  %v719_v33 = vpop.f32.mrb[8].mxu1 }
 0x121   : > { %v702_v34 = vpop.f32.mrb[9].mxu0  ;;  %v720_v35 = vpop.f32.mrb[9].mxu1 }
 0x122   : > { %v703_v36 = vadd.f32 %v702_v34, %v701_v32  ;;  %v721_v37 = vadd.f32 %v720_v35, %v719_v33 }
 0x124   : > { %507 = vst [vmem:[%s1061_s6 + $0x20] sm:$0xff] %v703_v36  ;;  %513 = vst [vmem:[%s1061_s6 + $0x50] sm:$0xff] %v721_v37  ;;  %v704_v38 = vpop.f32.mrb[10].mxu0  ;;  %v722_v39 = vpop.f32.mrb[10].mxu1 }
 0x125   : > { %v705_v40 = vpop.f32.mrb[11].mxu0  ;;  %v723_v41 = vpop.f32.mrb[11].mxu1 }
 0x126   : > { %v706_v42 = vadd.f32 %v705_v40, %v704_v38  ;;  %v724_v43 = vadd.f32 %v723_v41, %v722_v39 }
 0x128   : > { %508 = vst [vmem:[%s1061_s6 + $0x28] sm:$0xff] %v706_v42  ;;  %514 = vst [vmem:[%s1061_s6 + $0x58] sm:$0xff] %v724_v43 }
 0x129   : > { %846 = shalt.err (!%p843_p5)
}
 0x12a   : > { %s847_s26 = scalar_lea.hbm %s1078_s18, 1536  ;;  %s851_s29 = scalar_lea.hbm %s1134_s2, 3072 }
 0x12b   : > { %p848_p6 = scmp.ne.s32.totalorder %s1078_s18, %s847_s26  ;;  %p852_p10 = scmp.lt.u32.totalorder %s1078_s18, %s1134_s2 }
 0x12c   : > { %p853_p11 = scmp.lt.u32.totalorder %s851_s29, %s847_s26  ;;  %p855_p13 = scmp.lt.u32.totalorder %s847_s26, %s1078_s18 }
 0x12d   : > { %p849_p7 = pnand %p848_p6, %p971_p4 }
 0x12e   : > { %p854_p12 = por %p853_p11, %p852_p10 }
 0x12f   : > { %p850_p9 = pneg %p849_p7 }
 0x130   : > { %p856_p0 = por %p855_p13, %p854_p12 }
 0x132   : > { %p857_p1 = pnand %p856_p0, %p850_p9 }
 0x134   : > { %860 = shalt.err (!%p857_p1)
}
 0x135   : > { %s914_s4 = smov 128   ;;  %s915_s5 = smov 8  }
 0x136   : > { %776 = dma.vmem_to_hbm [thread:$0]  (%p971_p4), %s1080_s8, 1536, %s1078_s18, %s1086_s12, %s914_s4, %s914_s4, %s915_s5  }
 0x137 PF: > { %p782_p2 = scmp.ge.s32.totalorder %s911_s14, 2  ;;  %s547_s6 = sand.u32 1, %s891_s9  }
 0x138   : > { %s548_s7 = scalar_lea.sflag [#allocation4], %s547_s6 }
 0x139   : > { %p779_p3 = pnand %p782_p2, %p978_p8 }
 0x13b   : > { %886 = dma.done.wait (!%p779_p3), %s548_s7, 1536  }
 0x13c   : > { %888 = vsyncadd (!%p779_p3), %s548_s7, 4294965760  ;;  %s15_s14 = sadd.s32 1, %s911_s14   ;;  %s1137_s9 = smov %s895_s10 }
 0x13d   : > { %p12_p5 = scmp.ge.s32.totalorder %s15_s14, 4   ;;  %s1138_s10 = smov %s899_s11 }
 0x13e   : > { %s1139_s11 = smov %s984_s22  ;;  %s1140_s12 = smov %s907_s13 }
 0x13f   : > { %s1141_s13 = smov %s1143_s17  ;;  %14 = sbr.rel (!%p12_p5) target bundleno = 4 (0x4), region = 74 }
 0x146   :  { %553 = vsyncpa [#allocation4], 1 }
 0x147   :  { %555 = vsyncpa [#allocation4 + $0x1], 1 }

</bundles_post_ra>
